<compile_context>
chip_gen: v5e
topology: v5e:2x2
jax: 0.10.0
libtpu: 0.0.40
codegen_flags: <defaults>
</compile_context>

<pallas_src>
import jax
import jax.numpy as jnp
from jax.experimental import pallas as pl
from jax.experimental.pallas import tpu as pltpu


def _make_double_conv_dsc_kernel(w2: int):
    """Fused DoubleConvDSC kernel for one batch element.

    All refs are channels-first with spatial flattened on the lane axis:
      x_ref   : (1, C_in, HW)    pooled input
      nl/nr   : (1, HW)          0/1 masks killing row-boundary wrap-around
      dw*_ref : (9, C, 1)        depthwise 3x3 taps, k = 3*i + j
      db*_ref : (C, 1)           depthwise bias
      pw*_ref : (C_out, C_in)    pointwise 1x1 weight
      a*_ref  : (C_out, 1)       folded BN scale  gamma / sqrt(var + eps)
      c*_ref  : (C_out, 1)       folded BN shift  scale*(pw_b - mean) + beta
      o_ref   : (1, C_out, HW)
    """

    def kernel(x_ref, nl_ref, nr_ref,
               dw1_ref, db1_ref, pw1_ref, a1_ref, c1_ref,
               dw2_ref, db2_ref, pw2_ref, a2_ref, c2_ref,
               o_ref):
        f32 = jnp.float32
        x = x_ref[0].astype(f32)              # (C_in, HW)
        nl = nl_ref[...].astype(f32)          # (1, HW)
        nr = nr_ref[...].astype(f32)          # (1, HW)

        def depthwise3x3(t, dw_ref, db_ref):
            c, hw = t.shape
            acc = jnp.zeros_like(t)
            k = 0
            for dy in (-1, 0, 1):
                for dx in (-1, 0, 1):
                    s = dy * w2 + dx          # flat shift: shifted[f] = t[f + s]
                    if s == 0:
                        shifted = t
                    elif abs(s) >= hw:
                        shifted = jnp.zeros_like(t)
                    elif s > 0:
                        shifted = jnp.concatenate(
                            [t[:, s:], jnp.zeros((c, s), f32)], axis=1)
                    else:
                        shifted = jnp.concatenate(
                            [jnp.zeros((c, -s), f32), t[:, :hw + s]], axis=1)
                    if dx == 1:               # kill wrap-around from next row
                        shifted = shifted * nr
                    elif dx == -1:            # kill wrap-around from prev row
                        shifted = shifted * nl
                    acc = acc + shifted * dw_ref[k].astype(f32)
                    k += 1
            return acc + db_ref[...].astype(f32)

        # --- Conv2dDSC #1 + BN + ReLU ---
        t1 = depthwise3x3(x, dw1_ref, db1_ref)                     # (C_in, HW)
        u1 = jnp.dot(pw1_ref[...].astype(f32), t1,
                     preferred_element_type=jnp.float32)           # (mid, HW)
        v1 = jnp.maximum(a1_ref[...].astype(f32) * u1
                         + c1_ref[...].astype(f32), 0.0)

        # --- Conv2dDSC #2 + BN + ReLU ---
        t2 = depthwise3x3(v1, dw2_ref, db2_ref)                    # (mid, HW)
        u2 = jnp.dot(pw2_ref[...].astype(f32), t2,
                     preferred_element_type=jnp.float32)           # (C_out, HW)
        v2 = jnp.maximum(a2_ref[...].astype(f32) * u2
                         + c2_ref[...].astype(f32), 0.0)

        o_ref[0] = v2.astype(o_ref.dtype)

    return kernel


def down_dsc(x, p1, p2, *, eps=1e-5):
    """Forward pass of DownDSC: MaxPool2d(2) -> DoubleConvDSC.

    x  : (N, C_in, H, W)
    p1 : Conv2dDSC(in, mid) + BN params (dict with PyTorch weight layouts)
    p2 : Conv2dDSC(mid, out) + BN params
    returns (N, C_out, H//2, W//2)
    """
    N, C_in, H, W = x.shape
    assert H % 2 == 0 and W % 2 == 0, "MaxPool2d(2) expects even H, W"
    H2, W2 = H // 2, W // 2
    HW = H2 * W2
    mid = p1["pw_w"].shape[0]
    C_out = p2["pw_w"].shape[0]
    dtype = x.dtype
    itemsize = jnp.dtype(dtype).itemsize

    # MaxPool2d(2): cheap XLA reduction; output is already flattened so the
    # Pallas kernel sees HW on the lane axis (no transposes anywhere).
    x_pool = (x.reshape(N, C_in, H2, 2, W2, 2)
                .max(axis=(3, 5))
                .reshape(N, C_in, HW))

    # Row-edge masks for the flattened depthwise shifts.
    col = jnp.arange(HW, dtype=jnp.int32) % W2
    not_left = (col != 0).astype(dtype).reshape(1, HW)
    not_right = (col != W2 - 1).astype(dtype).reshape(1, HW)

    def prep(p):
        c_in = p["dw_w"].shape[0]
        c_out = p["pw_w"].shape[0]
        dw_w = p["dw_w"].reshape(c_in, 9).T.reshape(9, c_in, 1)
        dw_b = p["dw_b"].reshape(c_in, 1)
        pw_w = p["pw_w"].reshape(c_out, c_in)
        scale = p["bn_gamma"] / jnp.sqrt(p["bn_var"] + eps)
        bn_a = scale.reshape(c_out, 1)
        bn_c = (scale * (p["pw_b"] - p["bn_mean"]) + p["bn_beta"]).reshape(c_out, 1)
        return dw_w, dw_b, pw_w, bn_a, bn_c

    dw1_w, dw1_b, pw1_w, bn1_a, bn1_c = prep(p1)
    dw2_w, dw2_b, pw2_w, bn2_a, bn2_c = prep(p2)

    def full(shape):
        return pl.BlockSpec(shape, lambda n: (0,) * len(shape))

    n_wts = (10 * C_in + mid * (C_in + 12) + C_out * (mid + 2) + 2 * HW)
    # VMEM budget: double-buffered in/out blocks + resident weights + f32 temps,
    # clamped to [32 MiB, 64 MiB] (legal on v5e/v6e 128 MiB and v7x 64 MiB).
    est = (itemsize * 2 * ((C_in + C_out) * HW + n_wts)
           + 4 * 4 * (C_in + 3 * mid + C_out) * HW)
    vmem_limit = int(min(64 * 2**20, max(32 * 2**20, 2 * est)))

    flops = 2 * N * HW * (9 * C_in + C_in * mid + 9 * mid + mid * C_out)
    bytes_accessed = itemsize * (N * HW * (C_in + C_out) + n_wts)

    out_flat = pl.pallas_call(
        _make_double_conv_dsc_kernel(W2),
        out_shape=jax.ShapeDtypeStruct((N, C_out, HW), dtype),
        grid_spec=pltpu.PrefetchScalarGridSpec(
            num_scalar_prefetch=0,
            grid=(N,),
            in_specs=[
                pl.BlockSpec((1, C_in, HW), lambda n: (n, 0, 0)),
                full((1, HW)), full((1, HW)),
                full((9, C_in, 1)), full((C_in, 1)), full((mid, C_in)),
                full((mid, 1)), full((mid, 1)),
                full((9, mid, 1)), full((mid, 1)), full((C_out, mid)),
                full((C_out, 1)), full((C_out, 1)),
            ],
            out_specs=pl.BlockSpec((1, C_out, HW), lambda n: (n, 0, 0)),
        ),
        compiler_params=pltpu.CompilerParams(
            dimension_semantics=("parallel",),
            vmem_limit_bytes=vmem_limit,
        ),
        cost_estimate=pl.CostEstimate(
            flops=flops, transcendentals=0, bytes_accessed=bytes_accessed),
    )(x_pool, not_left, not_right,
      dw1_w, dw1_b, pw1_w, bn1_a, bn1_c,
      dw2_w, dw2_b, pw2_w, bn2_a, bn2_c)

    return out_flat.reshape(N, C_out, H2, W2)


# ---------------- pure-JAX reference (for the correctness check) -------------

def _ref_depthwise3x3(x, w, b):
    # x: (N, C, H, W), w: (C, 1, 3, 3), b: (C,)
    N, C, H, W = x.shape
    xp = jnp.pad(x, ((0, 0), (0, 0), (1, 1), (1, 1)))
    out = jnp.zeros_like(x)
    for i in range(3):
        for j in range(3):
            out = out + xp[:, :, i:i + H, j:j + W] * w[:, 0, i, j].reshape(1, C, 1, 1)
    return out + b.reshape(1, C, 1, 1)


def _ref_down_dsc(x, p1, p2, eps=1e-5):
    N, C, H, W = x.shape
    t = x.reshape(N, C, H // 2, 2, W // 2, 2).max(axis=(3, 5))
    for p in (p1, p2):
        c_out = p["pw_w"].shape[0]
        t = _ref_depthwise3x3(t, p["dw_w"], p["dw_b"])
        t = jnp.einsum("oc,nchw->nohw", p["pw_w"].reshape(c_out, -1), t,
                       precision=jax.lax.Precision.HIGHEST) \
            + p["pw_b"].reshape(1, c_out, 1, 1)
        scale = p["bn_gamma"] / jnp.sqrt(p["bn_var"] + eps)
        t = ((t - p["bn_mean"].reshape(1, c_out, 1, 1))
             * scale.reshape(1, c_out, 1, 1)
             + p["bn_beta"].reshape(1, c_out, 1, 1))
        t = jnp.maximum(t, 0.0)
    return t


if __name__ == "__main__":
    key = jax.random.PRNGKey(0)
    keys = jax.random.split(key, 17)

    N, C_in, C_out, H, W = 2, 4, 8, 16, 16
    mid = C_out   # DoubleConvDSC default: mid_channels = out_channels

    x = jax.random.normal(keys[0], (N, C_in, H, W), dtype=jnp.float32)

    def make_block_params(ks, c_in, c_out):
        k0, k1, k2, k3, k4, k5, k6, k7 = ks
        bd_dw = 1.0 / 3.0               # depthwise fan_in = 9
        bd_pw = 1.0 / (c_in ** 0.5)     # pointwise fan_in = c_in
        return dict(
            dw_w=jax.random.uniform(k0, (c_in, 1, 3, 3), minval=-bd_dw,
                                    maxval=bd_dw, dtype=jnp.float32),
            dw_b=jax.random.uniform(k1, (c_in,), minval=-bd_dw, maxval=bd_dw,
                                    dtype=jnp.float32),
            pw_w=jax.random.uniform(k2, (c_out, c_in, 1, 1), minval=-bd_pw,
                                    maxval=bd_pw, dtype=jnp.float32),
            pw_b=jax.random.uniform(k3, (c_out,), minval=-bd_pw, maxval=bd_pw,
                                    dtype=jnp.float32),
            bn_gamma=jax.random.uniform(k4, (c_out,), minval=0.5, maxval=1.5,
                                        dtype=jnp.float32),
            bn_beta=jax.random.uniform(k5, (c_out,), minval=-0.5, maxval=0.5,
                                       dtype=jnp.float32),
            bn_mean=0.1 * jax.random.normal(k6, (c_out,), dtype=jnp.float32),
            bn_var=jax.random.uniform(k7, (c_out,), minval=0.5, maxval=1.5,
                                      dtype=jnp.float32),
        )

    p1 = make_block_params(keys[1:9], C_in, mid)
    p2 = make_block_params(keys[9:17], mid, C_out)

    y = down_dsc(x, p1, p2)
    y = jax.block_until_ready(y)

    y_ref = _ref_down_dsc(x, p1, p2)
    assert y.shape == (N, C_out, H // 2, W // 2)
    max_err = float(jnp.max(jnp.abs(y - y_ref)))
    assert jnp.allclose(y, y_ref, atol=1e-4, rtol=1e-4), f"max_err={max_err}"

    print("KERNEL_OK")
</pallas_src>

<mosaic_0001>
module attributes {stable_mosaic.version = 11 : i64} {
  func.func @kernel(%arg0: i32, %arg1: memref<1x4x64xf32, #tpu.memory_space<vmem>>, %arg2: memref<1x64xf32, #tpu.memory_space<vmem>>, %arg3: memref<1x64xf32, #tpu.memory_space<vmem>>, %arg4: memref<9x4x1xf32, #tpu.memory_space<vmem>>, %arg5: memref<4x1xf32, #tpu.memory_space<vmem>>, %arg6: memref<8x4xf32, #tpu.memory_space<vmem>>, %arg7: memref<8x1xf32, #tpu.memory_space<vmem>>, %arg8: memref<8x1xf32, #tpu.memory_space<vmem>>, %arg9: memref<9x8x1xf32, #tpu.memory_space<vmem>>, %arg10: memref<8x1xf32, #tpu.memory_space<vmem>>, %arg11: memref<8x8xf32, #tpu.memory_space<vmem>>, %arg12: memref<8x1xf32, #tpu.memory_space<vmem>>, %arg13: memref<8x1xf32, #tpu.memory_space<vmem>>, %arg14: memref<1x8x64xf32, #tpu.memory_space<vmem>>) attributes {dimension_semantics = [#tpu.dimension_semantics<parallel>], iteration_bounds = array<i64: 2>, scalar_prefetch = 0 : i64, scratch_operands = 0 : i64, tpu.core_type = #tpu.core_type<tc>, window_params = [{transform_indices = @transform_0, window_bounds = array<i64: 1, 4, 64>}, {pipeline_mode = #tpu.pipeline_mode<synchronous>, transform_indices = @transform_1, window_bounds = array<i64: 1, 64>}, {pipeline_mode = #tpu.pipeline_mode<synchronous>, transform_indices = @transform_2, window_bounds = array<i64: 1, 64>}, {pipeline_mode = #tpu.pipeline_mode<synchronous>, transform_indices = @transform_3, window_bounds = array<i64: 9, 4, 1>}, {pipeline_mode = #tpu.pipeline_mode<synchronous>, transform_indices = @transform_4, window_bounds = array<i64: 4, 1>}, {pipeline_mode = #tpu.pipeline_mode<synchronous>, transform_indices = @transform_5, window_bounds = array<i64: 8, 4>}, {pipeline_mode = #tpu.pipeline_mode<synchronous>, transform_indices = @transform_6, window_bounds = array<i64: 8, 1>}, {pipeline_mode = #tpu.pipeline_mode<synchronous>, transform_indices = @transform_7, window_bounds = array<i64: 8, 1>}, {pipeline_mode = #tpu.pipeline_mode<synchronous>, transform_indices = @transform_8, window_bounds = array<i64: 9, 8, 1>}, {pipeline_mode = #tpu.pipeline_mode<synchronous>, transform_indices = @transform_9, window_bounds = array<i64: 8, 1>}, {pipeline_mode = #tpu.pipeline_mode<synchronous>, transform_indices = @transform_10, window_bounds = array<i64: 8, 8>}, {pipeline_mode = #tpu.pipeline_mode<synchronous>, transform_indices = @transform_11, window_bounds = array<i64: 8, 1>}, {pipeline_mode = #tpu.pipeline_mode<synchronous>, transform_indices = @transform_12, window_bounds = array<i64: 8, 1>}, {transform_indices = @transform_13, window_bounds = array<i64: 1, 8, 64>}]} {
    %c0 = arith.constant 0 : index
    %c0_0 = arith.constant 0 : index
    %c0_1 = arith.constant 0 : index
    %0 = vector.load %arg1[%c0, %c0_0, %c0_1] : memref<1x4x64xf32, #tpu.memory_space<vmem>>, vector<1x4x64xf32>
    %1 = vector.shape_cast %0 : vector<1x4x64xf32> to vector<4x64xf32>
    %c0_2 = arith.constant 0 : index
    %c0_3 = arith.constant 0 : index
    %2 = vector.load %arg2[%c0_2, %c0_3] : memref<1x64xf32, #tpu.memory_space<vmem>>, vector<1x64xf32>
    %c0_4 = arith.constant 0 : index
    %c0_5 = arith.constant 0 : index
    %3 = vector.load %arg3[%c0_4, %c0_5] : memref<1x64xf32, #tpu.memory_space<vmem>>, vector<1x64xf32>
    %cst = arith.constant 0.000000e+00 : f32
    %4 = vector.broadcast %cst : f32 to vector<4x64xf32>
    %cst_6 = arith.constant 0.000000e+00 : f32
    %5 = vector.broadcast %cst_6 : f32 to vector<4x9xf32>
    %6 = vector.extract_strided_slice %1 {offsets = [0, 0], sizes = [4, 55], strides = [1, 1]} : vector<4x64xf32> to vector<4x55xf32>
    %7 = tpu.concatenate %5, %6 in 1 : vector<4x9xf32>, vector<4x55xf32> -> vector<4x64xf32>
    %8 = vector.broadcast %2 : vector<1x64xf32> to vector<4x64xf32>
    %9 = arith.mulf %7, %8 : vector<4x64xf32>
    %c0_7 = arith.constant 0 : index
    %c0_8 = arith.constant 0 : index
    %c0_9 = arith.constant 0 : index
    %10 = vector.load %arg4[%c0_7, %c0_8, %c0_9] : memref<9x4x1xf32, #tpu.memory_space<vmem>>, vector<1x4x1xf32>
    %11 = vector.shape_cast %10 : vector<1x4x1xf32> to vector<4x1xf32>
    %12 = vector.broadcast %11 : vector<4x1xf32> to vector<4x64xf32>
    %13 = arith.mulf %9, %12 : vector<4x64xf32>
    %14 = arith.addf %4, %13 : vector<4x64xf32>
    %cst_10 = arith.constant 0.000000e+00 : f32
    %15 = vector.broadcast %cst_10 : f32 to vector<4x8xf32>
    %16 = vector.extract_strided_slice %1 {offsets = [0, 0], sizes = [4, 56], strides = [1, 1]} : vector<4x64xf32> to vector<4x56xf32>
    %17 = tpu.concatenate %15, %16 in 1 : vector<4x8xf32>, vector<4x56xf32> -> vector<4x64xf32>
    %c1 = arith.constant 1 : index
    %c0_11 = arith.constant 0 : index
    %c0_12 = arith.constant 0 : index
    %18 = vector.load %arg4[%c1, %c0_11, %c0_12] : memref<9x4x1xf32, #tpu.memory_space<vmem>>, vector<1x4x1xf32>
    %19 = vector.shape_cast %18 : vector<1x4x1xf32> to vector<4x1xf32>
    %20 = vector.broadcast %19 : vector<4x1xf32> to vector<4x64xf32>
    %21 = arith.mulf %17, %20 : vector<4x64xf32>
    %22 = arith.addf %14, %21 : vector<4x64xf32>
    %cst_13 = arith.constant 0.000000e+00 : f32
    %23 = vector.broadcast %cst_13 : f32 to vector<4x7xf32>
    %24 = vector.extract_strided_slice %1 {offsets = [0, 0], sizes = [4, 57], strides = [1, 1]} : vector<4x64xf32> to vector<4x57xf32>
    %25 = tpu.concatenate %23, %24 in 1 : vector<4x7xf32>, vector<4x57xf32> -> vector<4x64xf32>
    %26 = vector.broadcast %3 : vector<1x64xf32> to vector<4x64xf32>
    %27 = arith.mulf %25, %26 : vector<4x64xf32>
    %c2 = arith.constant 2 : index
    %c0_14 = arith.constant 0 : index
    %c0_15 = arith.constant 0 : index
    %28 = vector.load %arg4[%c2, %c0_14, %c0_15] : memref<9x4x1xf32, #tpu.memory_space<vmem>>, vector<1x4x1xf32>
    %29 = vector.shape_cast %28 : vector<1x4x1xf32> to vector<4x1xf32>
    %30 = vector.broadcast %29 : vector<4x1xf32> to vector<4x64xf32>
    %31 = arith.mulf %27, %30 : vector<4x64xf32>
    %32 = arith.addf %22, %31 : vector<4x64xf32>
    %cst_16 = arith.constant 0.000000e+00 : f32
    %33 = vector.broadcast %cst_16 : f32 to vector<4x1xf32>
    %34 = vector.extract_strided_slice %1 {offsets = [0, 0], sizes = [4, 63], strides = [1, 1]} : vector<4x64xf32> to vector<4x63xf32>
    %35 = tpu.concatenate %33, %34 in 1 : vector<4x1xf32>, vector<4x63xf32> -> vector<4x64xf32>
    %36 = vector.broadcast %2 : vector<1x64xf32> to vector<4x64xf32>
    %37 = arith.mulf %35, %36 : vector<4x64xf32>
    %c3 = arith.constant 3 : index
    %c0_17 = arith.constant 0 : index
    %c0_18 = arith.constant 0 : index
    %38 = vector.load %arg4[%c3, %c0_17, %c0_18] : memref<9x4x1xf32, #tpu.memory_space<vmem>>, vector<1x4x1xf32>
    %39 = vector.shape_cast %38 : vector<1x4x1xf32> to vector<4x1xf32>
    %40 = vector.broadcast %39 : vector<4x1xf32> to vector<4x64xf32>
    %41 = arith.mulf %37, %40 : vector<4x64xf32>
    %42 = arith.addf %32, %41 : vector<4x64xf32>
    %c4 = arith.constant 4 : index
    %c0_19 = arith.constant 0 : index
    %c0_20 = arith.constant 0 : index
    %43 = vector.load %arg4[%c4, %c0_19, %c0_20] : memref<9x4x1xf32, #tpu.memory_space<vmem>>, vector<1x4x1xf32>
    %44 = vector.shape_cast %43 : vector<1x4x1xf32> to vector<4x1xf32>
    %45 = vector.broadcast %44 : vector<4x1xf32> to vector<4x64xf32>
    %46 = arith.mulf %1, %45 : vector<4x64xf32>
    %47 = arith.addf %42, %46 : vector<4x64xf32>
    %48 = vector.extract_strided_slice %1 {offsets = [0, 1], sizes = [4, 63], strides = [1, 1]} : vector<4x64xf32> to vector<4x63xf32>
    %cst_21 = arith.constant 0.000000e+00 : f32
    %49 = vector.broadcast %cst_21 : f32 to vector<4x1xf32>
    %50 = tpu.concatenate %48, %49 in 1 : vector<4x63xf32>, vector<4x1xf32> -> vector<4x64xf32>
    %51 = vector.broadcast %3 : vector<1x64xf32> to vector<4x64xf32>
    %52 = arith.mulf %50, %51 : vector<4x64xf32>
    %c5 = arith.constant 5 : index
    %c0_22 = arith.constant 0 : index
    %c0_23 = arith.constant 0 : index
    %53 = vector.load %arg4[%c5, %c0_22, %c0_23] : memref<9x4x1xf32, #tpu.memory_space<vmem>>, vector<1x4x1xf32>
    %54 = vector.shape_cast %53 : vector<1x4x1xf32> to vector<4x1xf32>
    %55 = vector.broadcast %54 : vector<4x1xf32> to vector<4x64xf32>
    %56 = arith.mulf %52, %55 : vector<4x64xf32>
    %57 = arith.addf %47, %56 : vector<4x64xf32>
    %58 = vector.extract_strided_slice %1 {offsets = [0, 7], sizes = [4, 57], strides = [1, 1]} : vector<4x64xf32> to vector<4x57xf32>
    %cst_24 = arith.constant 0.000000e+00 : f32
    %59 = vector.broadcast %cst_24 : f32 to vector<4x7xf32>
    %60 = tpu.concatenate %58, %59 in 1 : vector<4x57xf32>, vector<4x7xf32> -> vector<4x64xf32>
    %61 = vector.broadcast %2 : vector<1x64xf32> to vector<4x64xf32>
    %62 = arith.mulf %60, %61 : vector<4x64xf32>
    %c6 = arith.constant 6 : index
    %c0_25 = arith.constant 0 : index
    %c0_26 = arith.constant 0 : index
    %63 = vector.load %arg4[%c6, %c0_25, %c0_26] : memref<9x4x1xf32, #tpu.memory_space<vmem>>, vector<1x4x1xf32>
    %64 = vector.shape_cast %63 : vector<1x4x1xf32> to vector<4x1xf32>
    %65 = vector.broadcast %64 : vector<4x1xf32> to vector<4x64xf32>
    %66 = arith.mulf %62, %65 : vector<4x64xf32>
    %67 = arith.addf %57, %66 : vector<4x64xf32>
    %68 = vector.extract_strided_slice %1 {offsets = [0, 8], sizes = [4, 56], strides = [1, 1]} : vector<4x64xf32> to vector<4x56xf32>
    %cst_27 = arith.constant 0.000000e+00 : f32
    %69 = vector.broadcast %cst_27 : f32 to vector<4x8xf32>
    %70 = tpu.concatenate %68, %69 in 1 : vector<4x56xf32>, vector<4x8xf32> -> vector<4x64xf32>
    %c7 = arith.constant 7 : index
    %c0_28 = arith.constant 0 : index
    %c0_29 = arith.constant 0 : index
    %71 = vector.load %arg4[%c7, %c0_28, %c0_29] : memref<9x4x1xf32, #tpu.memory_space<vmem>>, vector<1x4x1xf32>
    %72 = vector.shape_cast %71 : vector<1x4x1xf32> to vector<4x1xf32>
    %73 = vector.broadcast %72 : vector<4x1xf32> to vector<4x64xf32>
    %74 = arith.mulf %70, %73 : vector<4x64xf32>
    %75 = arith.addf %67, %74 : vector<4x64xf32>
    %76 = vector.extract_strided_slice %1 {offsets = [0, 9], sizes = [4, 55], strides = [1, 1]} : vector<4x64xf32> to vector<4x55xf32>
    %cst_30 = arith.constant 0.000000e+00 : f32
    %77 = vector.broadcast %cst_30 : f32 to vector<4x9xf32>
    %78 = tpu.concatenate %76, %77 in 1 : vector<4x55xf32>, vector<4x9xf32> -> vector<4x64xf32>
    %79 = vector.broadcast %3 : vector<1x64xf32> to vector<4x64xf32>
    %80 = arith.mulf %78, %79 : vector<4x64xf32>
    %c8 = arith.constant 8 : index
    %c0_31 = arith.constant 0 : index
    %c0_32 = arith.constant 0 : index
    %81 = vector.load %arg4[%c8, %c0_31, %c0_32] : memref<9x4x1xf32, #tpu.memory_space<vmem>>, vector<1x4x1xf32>
    %82 = vector.shape_cast %81 : vector<1x4x1xf32> to vector<4x1xf32>
    %83 = vector.broadcast %82 : vector<4x1xf32> to vector<4x64xf32>
    %84 = arith.mulf %80, %83 : vector<4x64xf32>
    %85 = arith.addf %75, %84 : vector<4x64xf32>
    %c0_33 = arith.constant 0 : index
    %c0_34 = arith.constant 0 : index
    %86 = vector.load %arg5[%c0_33, %c0_34] : memref<4x1xf32, #tpu.memory_space<vmem>>, vector<4x1xf32>
    %87 = vector.broadcast %86 : vector<4x1xf32> to vector<4x64xf32>
    %88 = arith.addf %85, %87 : vector<4x64xf32>
    %c0_35 = arith.constant 0 : index
    %c0_36 = arith.constant 0 : index
    %89 = vector.load %arg6[%c0_35, %c0_36] : memref<8x4xf32, #tpu.memory_space<vmem>>, vector<8x4xf32>
    %cst_37 = arith.constant dense<0.000000e+00> : vector<8x64xf32>
    %90 = tpu.matmul %89, %88, %cst_37 {dimension_numbers = #tpu.dot_dimension_numbers<[1], [0], [0], [1], [0, 0, 1, 1], [], []>} : vector<8x4xf32>, vector<4x64xf32>, vector<8x64xf32> -> vector<8x64xf32>
    %c0_38 = arith.constant 0 : index
    %c0_39 = arith.constant 0 : index
    %91 = vector.load %arg7[%c0_38, %c0_39] : memref<8x1xf32, #tpu.memory_space<vmem>>, vector<8x1xf32>
    %92 = vector.broadcast %91 : vector<8x1xf32> to vector<8x64xf32>
    %93 = arith.mulf %92, %90 : vector<8x64xf32>
    %c0_40 = arith.constant 0 : index
    %c0_41 = arith.constant 0 : index
    %94 = vector.load %arg8[%c0_40, %c0_41] : memref<8x1xf32, #tpu.memory_space<vmem>>, vector<8x1xf32>
    %95 = vector.broadcast %94 : vector<8x1xf32> to vector<8x64xf32>
    %96 = arith.addf %93, %95 : vector<8x64xf32>
    %cst_42 = arith.constant 0.000000e+00 : f32
    %97 = vector.broadcast %cst_42 : f32 to vector<8x64xf32>
    %98 = arith.maximumf %96, %97 : vector<8x64xf32>
    %cst_43 = arith.constant 0.000000e+00 : f32
    %99 = vector.broadcast %cst_43 : f32 to vector<8x64xf32>
    %cst_44 = arith.constant 0.000000e+00 : f32
    %100 = vector.broadcast %cst_44 : f32 to vector<8x9xf32>
    %101 = vector.extract_strided_slice %98 {offsets = [0, 0], sizes = [8, 55], strides = [1, 1]} : vector<8x64xf32> to vector<8x55xf32>
    %102 = tpu.concatenate %100, %101 in 1 : vector<8x9xf32>, vector<8x55xf32> -> vector<8x64xf32>
    %103 = vector.broadcast %2 : vector<1x64xf32> to vector<8x64xf32>
    %104 = arith.mulf %102, %103 : vector<8x64xf32>
    %c0_45 = arith.constant 0 : index
    %c0_46 = arith.constant 0 : index
    %c0_47 = arith.constant 0 : index
    %105 = vector.load %arg9[%c0_45, %c0_46, %c0_47] : memref<9x8x1xf32, #tpu.memory_space<vmem>>, vector<1x8x1xf32>
    %106 = vector.shape_cast %105 : vector<1x8x1xf32> to vector<8x1xf32>
    %107 = vector.broadcast %106 : vector<8x1xf32> to vector<8x64xf32>
    %108 = arith.mulf %104, %107 : vector<8x64xf32>
    %109 = arith.addf %99, %108 : vector<8x64xf32>
    %cst_48 = arith.constant 0.000000e+00 : f32
    %110 = vector.broadcast %cst_48 : f32 to vector<8x8xf32>
    %111 = vector.extract_strided_slice %98 {offsets = [0, 0], sizes = [8, 56], strides = [1, 1]} : vector<8x64xf32> to vector<8x56xf32>
    %112 = tpu.concatenate %110, %111 in 1 : vector<8x8xf32>, vector<8x56xf32> -> vector<8x64xf32>
    %c1_49 = arith.constant 1 : index
    %c0_50 = arith.constant 0 : index
    %c0_51 = arith.constant 0 : index
    %113 = vector.load %arg9[%c1_49, %c0_50, %c0_51] : memref<9x8x1xf32, #tpu.memory_space<vmem>>, vector<1x8x1xf32>
    %114 = vector.shape_cast %113 : vector<1x8x1xf32> to vector<8x1xf32>
    %115 = vector.broadcast %114 : vector<8x1xf32> to vector<8x64xf32>
    %116 = arith.mulf %112, %115 : vector<8x64xf32>
    %117 = arith.addf %109, %116 : vector<8x64xf32>
    %cst_52 = arith.constant 0.000000e+00 : f32
    %118 = vector.broadcast %cst_52 : f32 to vector<8x7xf32>
    %119 = vector.extract_strided_slice %98 {offsets = [0, 0], sizes = [8, 57], strides = [1, 1]} : vector<8x64xf32> to vector<8x57xf32>
    %120 = tpu.concatenate %118, %119 in 1 : vector<8x7xf32>, vector<8x57xf32> -> vector<8x64xf32>
    %121 = vector.broadcast %3 : vector<1x64xf32> to vector<8x64xf32>
    %122 = arith.mulf %120, %121 : vector<8x64xf32>
    %c2_53 = arith.constant 2 : index
    %c0_54 = arith.constant 0 : index
    %c0_55 = arith.constant 0 : index
    %123 = vector.load %arg9[%c2_53, %c0_54, %c0_55] : memref<9x8x1xf32, #tpu.memory_space<vmem>>, vector<1x8x1xf32>
    %124 = vector.shape_cast %123 : vector<1x8x1xf32> to vector<8x1xf32>
    %125 = vector.broadcast %124 : vector<8x1xf32> to vector<8x64xf32>
    %126 = arith.mulf %122, %125 : vector<8x64xf32>
    %127 = arith.addf %117, %126 : vector<8x64xf32>
    %cst_56 = arith.constant 0.000000e+00 : f32
    %128 = vector.broadcast %cst_56 : f32 to vector<8x1xf32>
    %129 = vector.extract_strided_slice %98 {offsets = [0, 0], sizes = [8, 63], strides = [1, 1]} : vector<8x64xf32> to vector<8x63xf32>
    %130 = tpu.concatenate %128, %129 in 1 : vector<8x1xf32>, vector<8x63xf32> -> vector<8x64xf32>
    %131 = vector.broadcast %2 : vector<1x64xf32> to vector<8x64xf32>
    %132 = arith.mulf %130, %131 : vector<8x64xf32>
    %c3_57 = arith.constant 3 : index
    %c0_58 = arith.constant 0 : index
    %c0_59 = arith.constant 0 : index
    %133 = vector.load %arg9[%c3_57, %c0_58, %c0_59] : memref<9x8x1xf32, #tpu.memory_space<vmem>>, vector<1x8x1xf32>
    %134 = vector.shape_cast %133 : vector<1x8x1xf32> to vector<8x1xf32>
    %135 = vector.broadcast %134 : vector<8x1xf32> to vector<8x64xf32>
    %136 = arith.mulf %132, %135 : vector<8x64xf32>
    %137 = arith.addf %127, %136 : vector<8x64xf32>
    %c4_60 = arith.constant 4 : index
    %c0_61 = arith.constant 0 : index
    %c0_62 = arith.constant 0 : index
    %138 = vector.load %arg9[%c4_60, %c0_61, %c0_62] : memref<9x8x1xf32, #tpu.memory_space<vmem>>, vector<1x8x1xf32>
    %139 = vector.shape_cast %138 : vector<1x8x1xf32> to vector<8x1xf32>
    %140 = vector.broadcast %139 : vector<8x1xf32> to vector<8x64xf32>
    %141 = arith.mulf %98, %140 : vector<8x64xf32>
    %142 = arith.addf %137, %141 : vector<8x64xf32>
    %143 = vector.extract_strided_slice %98 {offsets = [0, 1], sizes = [8, 63], strides = [1, 1]} : vector<8x64xf32> to vector<8x63xf32>
    %cst_63 = arith.constant 0.000000e+00 : f32
    %144 = vector.broadcast %cst_63 : f32 to vector<8x1xf32>
    %145 = tpu.concatenate %143, %144 in 1 : vector<8x63xf32>, vector<8x1xf32> -> vector<8x64xf32>
    %146 = vector.broadcast %3 : vector<1x64xf32> to vector<8x64xf32>
    %147 = arith.mulf %145, %146 : vector<8x64xf32>
    %c5_64 = arith.constant 5 : index
    %c0_65 = arith.constant 0 : index
    %c0_66 = arith.constant 0 : index
    %148 = vector.load %arg9[%c5_64, %c0_65, %c0_66] : memref<9x8x1xf32, #tpu.memory_space<vmem>>, vector<1x8x1xf32>
    %149 = vector.shape_cast %148 : vector<1x8x1xf32> to vector<8x1xf32>
    %150 = vector.broadcast %149 : vector<8x1xf32> to vector<8x64xf32>
    %151 = arith.mulf %147, %150 : vector<8x64xf32>
    %152 = arith.addf %142, %151 : vector<8x64xf32>
    %153 = vector.extract_strided_slice %98 {offsets = [0, 7], sizes = [8, 57], strides = [1, 1]} : vector<8x64xf32> to vector<8x57xf32>
    %cst_67 = arith.constant 0.000000e+00 : f32
    %154 = vector.broadcast %cst_67 : f32 to vector<8x7xf32>
    %155 = tpu.concatenate %153, %154 in 1 : vector<8x57xf32>, vector<8x7xf32> -> vector<8x64xf32>
    %156 = vector.broadcast %2 : vector<1x64xf32> to vector<8x64xf32>
    %157 = arith.mulf %155, %156 : vector<8x64xf32>
    %c6_68 = arith.constant 6 : index
    %c0_69 = arith.constant 0 : index
    %c0_70 = arith.constant 0 : index
    %158 = vector.load %arg9[%c6_68, %c0_69, %c0_70] : memref<9x8x1xf32, #tpu.memory_space<vmem>>, vector<1x8x1xf32>
    %159 = vector.shape_cast %158 : vector<1x8x1xf32> to vector<8x1xf32>
    %160 = vector.broadcast %159 : vector<8x1xf32> to vector<8x64xf32>
    %161 = arith.mulf %157, %160 : vector<8x64xf32>
    %162 = arith.addf %152, %161 : vector<8x64xf32>
    %163 = vector.extract_strided_slice %98 {offsets = [0, 8], sizes = [8, 56], strides = [1, 1]} : vector<8x64xf32> to vector<8x56xf32>
    %cst_71 = arith.constant 0.000000e+00 : f32
    %164 = vector.broadcast %cst_71 : f32 to vector<8x8xf32>
    %165 = tpu.concatenate %163, %164 in 1 : vector<8x56xf32>, vector<8x8xf32> -> vector<8x64xf32>
    %c7_72 = arith.constant 7 : index
    %c0_73 = arith.constant 0 : index
    %c0_74 = arith.constant 0 : index
    %166 = vector.load %arg9[%c7_72, %c0_73, %c0_74] : memref<9x8x1xf32, #tpu.memory_space<vmem>>, vector<1x8x1xf32>
    %167 = vector.shape_cast %166 : vector<1x8x1xf32> to vector<8x1xf32>
    %168 = vector.broadcast %167 : vector<8x1xf32> to vector<8x64xf32>
    %169 = arith.mulf %165, %168 : vector<8x64xf32>
    %170 = arith.addf %162, %169 : vector<8x64xf32>
    %171 = vector.extract_strided_slice %98 {offsets = [0, 9], sizes = [8, 55], strides = [1, 1]} : vector<8x64xf32> to vector<8x55xf32>
    %cst_75 = arith.constant 0.000000e+00 : f32
    %172 = vector.broadcast %cst_75 : f32 to vector<8x9xf32>
    %173 = tpu.concatenate %171, %172 in 1 : vector<8x55xf32>, vector<8x9xf32> -> vector<8x64xf32>
    %174 = vector.broadcast %3 : vector<1x64xf32> to vector<8x64xf32>
    %175 = arith.mulf %173, %174 : vector<8x64xf32>
    %c8_76 = arith.constant 8 : index
    %c0_77 = arith.constant 0 : index
    %c0_78 = arith.constant 0 : index
    %176 = vector.load %arg9[%c8_76, %c0_77, %c0_78] : memref<9x8x1xf32, #tpu.memory_space<vmem>>, vector<1x8x1xf32>
    %177 = vector.shape_cast %176 : vector<1x8x1xf32> to vector<8x1xf32>
    %178 = vector.broadcast %177 : vector<8x1xf32> to vector<8x64xf32>
    %179 = arith.mulf %175, %178 : vector<8x64xf32>
    %180 = arith.addf %170, %179 : vector<8x64xf32>
    %c0_79 = arith.constant 0 : index
    %c0_80 = arith.constant 0 : index
    %181 = vector.load %arg10[%c0_79, %c0_80] : memref<8x1xf32, #tpu.memory_space<vmem>>, vector<8x1xf32>
    %182 = vector.broadcast %181 : vector<8x1xf32> to vector<8x64xf32>
    %183 = arith.addf %180, %182 : vector<8x64xf32>
    %c0_81 = arith.constant 0 : index
    %c0_82 = arith.constant 0 : index
    %184 = vector.load %arg11[%c0_81, %c0_82] : memref<8x8xf32, #tpu.memory_space<vmem>>, vector<8x8xf32>
    %cst_83 = arith.constant dense<0.000000e+00> : vector<8x64xf32>
    %185 = tpu.matmul %184, %183, %cst_83 {dimension_numbers = #tpu.dot_dimension_numbers<[1], [0], [0], [1], [0, 0, 1, 1], [], []>} : vector<8x8xf32>, vector<8x64xf32>, vector<8x64xf32> -> vector<8x64xf32>
    %c0_84 = arith.constant 0 : index
    %c0_85 = arith.constant 0 : index
    %186 = vector.load %arg12[%c0_84, %c0_85] : memref<8x1xf32, #tpu.memory_space<vmem>>, vector<8x1xf32>
    %187 = vector.broadcast %186 : vector<8x1xf32> to vector<8x64xf32>
    %188 = arith.mulf %187, %185 : vector<8x64xf32>
    %c0_86 = arith.constant 0 : index
    %c0_87 = arith.constant 0 : index
    %189 = vector.load %arg13[%c0_86, %c0_87] : memref<8x1xf32, #tpu.memory_space<vmem>>, vector<8x1xf32>
    %190 = vector.broadcast %189 : vector<8x1xf32> to vector<8x64xf32>
    %191 = arith.addf %188, %190 : vector<8x64xf32>
    %cst_88 = arith.constant 0.000000e+00 : f32
    %192 = vector.broadcast %cst_88 : f32 to vector<8x64xf32>
    %193 = arith.maximumf %191, %192 : vector<8x64xf32>
    %c0_89 = arith.constant 0 : index
    %c0_90 = arith.constant 0 : index
    %c0_91 = arith.constant 0 : index
    %194 = vector.load %arg14[%c0_89, %c0_90, %c0_91] : memref<1x8x64xf32, #tpu.memory_space<vmem>>, vector<1x8x64xf32>
    %195 = vector.shape_cast %194 : vector<1x8x64xf32> to vector<8x64xf32>
    %196 = vector.shape_cast %193 : vector<8x64xf32> to vector<1x8x64xf32>
    tpu.vector_store %arg14[%c0_89, %c0_90, %c0_91], %196 {strides = array<i32>} : memref<1x8x64xf32, #tpu.memory_space<vmem>>, vector<1x8x64xf32>,
    return
  }
  func.func @transform_0(%arg0: i32) -> (i32, i32, i32) {
    %c0_i32 = arith.constant 0 : i32
    %c0_i32_0 = arith.constant 0 : i32
    %c0_i32_1 = arith.constant 0 : i32
    return %arg0, %c0_i32, %c0_i32_0 : i32, i32, i32
  }
  func.func @transform_1(%arg0: i32) -> (i32, i32) {
    %c0_i32 = arith.constant 0 : i32
    %c0_i32_0 = arith.constant 0 : i32
    %c0_i32_1 = arith.constant 0 : i32
    return %c0_i32, %c0_i32_0 : i32, i32
  }
  func.func @transform_2(%arg0: i32) -> (i32, i32) {
    %c0_i32 = arith.constant 0 : i32
    %c0_i32_0 = arith.constant 0 : i32
    %c0_i32_1 = arith.constant 0 : i32
    return %c0_i32, %c0_i32_0 : i32, i32
  }
  func.func @transform_3(%arg0: i32) -> (i32, i32, i32) {
    %c0_i32 = arith.constant 0 : i32
    %c0_i32_0 = arith.constant 0 : i32
    %c0_i32_1 = arith.constant 0 : i32
    %c0_i32_2 = arith.constant 0 : i32
    return %c0_i32, %c0_i32_0, %c0_i32_1 : i32, i32, i32
  }
  func.func @transform_4(%arg0: i32) -> (i32, i32) {
    %c0_i32 = arith.constant 0 : i32
    %c0_i32_0 = arith.constant 0 : i32
    %c0_i32_1 = arith.constant 0 : i32
    return %c0_i32, %c0_i32_0 : i32, i32
  }
  func.func @transform_5(%arg0: i32) -> (i32, i32) {
    %c0_i32 = arith.constant 0 : i32
    %c0_i32_0 = arith.constant 0 : i32
    %c0_i32_1 = arith.constant 0 : i32
    return %c0_i32, %c0_i32_0 : i32, i32
  }
  func.func @transform_6(%arg0: i32) -> (i32, i32) {
    %c0_i32 = arith.constant 0 : i32
    %c0_i32_0 = arith.constant 0 : i32
    %c0_i32_1 = arith.constant 0 : i32
    return %c0_i32, %c0_i32_0 : i32, i32
  }
  func.func @transform_7(%arg0: i32) -> (i32, i32) {
    %c0_i32 = arith.constant 0 : i32
    %c0_i32_0 = arith.constant 0 : i32
    %c0_i32_1 = arith.constant 0 : i32
    return %c0_i32, %c0_i32_0 : i32, i32
  }
  func.func @transform_8(%arg0: i32) -> (i32, i32, i32) {
    %c0_i32 = arith.constant 0 : i32
    %c0_i32_0 = arith.constant 0 : i32
    %c0_i32_1 = arith.constant 0 : i32
    %c0_i32_2 = arith.constant 0 : i32
    return %c0_i32, %c0_i32_0, %c0_i32_1 : i32, i32, i32
  }
  func.func @transform_9(%arg0: i32) -> (i32, i32) {
    %c0_i32 = arith.constant 0 : i32
    %c0_i32_0 = arith.constant 0 : i32
    %c0_i32_1 = arith.constant 0 : i32
    return %c0_i32, %c0_i32_0 : i32, i32
  }
  func.func @transform_10(%arg0: i32) -> (i32, i32) {
    %c0_i32 = arith.constant 0 : i32
    %c0_i32_0 = arith.constant 0 : i32
    %c0_i32_1 = arith.constant 0 : i32
    return %c0_i32, %c0_i32_0 : i32, i32
  }
  func.func @transform_11(%arg0: i32) -> (i32, i32) {
    %c0_i32 = arith.constant 0 : i32
    %c0_i32_0 = arith.constant 0 : i32
    %c0_i32_1 = arith.constant 0 : i32
    return %c0_i32, %c0_i32_0 : i32, i32
  }
  func.func @transform_12(%arg0: i32) -> (i32, i32) {
    %c0_i32 = arith.constant 0 : i32
    %c0_i32_0 = arith.constant 0 : i32
    %c0_i32_1 = arith.constant 0 : i32
    return %c0_i32, %c0_i32_0 : i32, i32
  }
  func.func @transform_13(%arg0: i32) -> (i32, i32, i32) {
    %c0_i32 = arith.constant 0 : i32
    %c0_i32_0 = arith.constant 0 : i32
    %c0_i32_1 = arith.constant 0 : i32
    return %arg0, %c0_i32, %c0_i32_0 : i32, i32, i32
  }
}

</mosaic_0001>

<bundles_post_ra>
// kernel: tpu_custom_call.1
= control target key start
LH: loop header
LB: loop body
LE: loop exit
PB: predicated region body
PF: predicated region fallthrough
CT: control target
= control target key end

     0   :  { %s1319_s0 = inlined_call_operand.vmem [shape: f32[2,4,64], index: 0, kind: input, shape index: {}]   ;;  %s1320_s1 = inlined_call_operand.vmem [shape: f32[1,64], index: 1, kind: input, shape index: {}]   ;;  %s1321_s2 = inlined_call_operand.vmem [shape: f32[1,64], index: 2, kind: input, shape index: {}]   ;;  %s1322_s3 = inlined_call_operand.vmem [shape: f32[9,4,1], index: 3, kind: input, shape index: {}]   ;;  %s1323_s4 = inlined_call_operand.vmem [shape: f32[4,1], index: 4, kind: input, shape index: {}]   ;;  %s1324_s5 = inlined_call_operand.vmem [shape: f32[8,4], index: 5, kind: input, shape index: {}]   ;;  %s1325_s6 = inlined_call_operand.vmem [shape: f32[8,1], index: 6, kind: input, shape index: {}]   ;;  %s1326_s7 = inlined_call_operand.vmem [shape: f32[8,1], index: 7, kind: input, shape index: {}]   ;;  %s1327_s8 = inlined_call_operand.vmem [shape: f32[9,8,1], index: 8, kind: input, shape index: {}]   ;;  %s1328_s9 = inlined_call_operand.vmem [shape: f32[8,1], index: 9, kind: input, shape index: {}]   ;;  %s1329_s10 = inlined_call_operand.vmem [shape: f32[8,8], index: 10, kind: input, shape index: {}]   ;;  %s1330_s11 = inlined_call_operand.vmem [shape: f32[8,1], index: 11, kind: input, shape index: {}]   ;;  %s1331_s12 = inlined_call_operand.vmem [shape: f32[8,1], index: 12, kind: input, shape index: {}]   ;;  %s1332_s13 = inlined_call_operand.hbm [shape: f32[2,8,64], index: 13, kind: output, shape index: {}]  }
   0x1   :  { %1341 = sst [smem:[#allocation6_spill]] %s1319_s0 }
   0x2   :  { %1342 = sst [smem:[#allocation7_spill]] %s1320_s1 }
   0x3   :  { %18 = vsyncpa [#allocation3], 0 }
   0x4   :  { %20 = vsyncpa [#allocation3 + $0x1], 0  ;;  %s1090_s25 = smov 0   ;;  %s1092_s26 = smov 0  }
   0x5   :  { %s1094_s27 = smov 0   ;;  %s1096_s28 = smov 0  }
   0x6 LB: > { %s1111_s29 = sadd.s32 4294967295, %s1009_s28   ;;  %s865_s30 = sadd.s32 4294967294, %s1009_s28   ;;  %s1009_s28 = sphi %s1096_s28, %s1360_s28   ;;  %s1005_s27 = sphi %s1094_s27, %s1359_s27   ;;  %s1001_s26 = sphi %s1092_s26, %s1358_s26   ;;  %s997_s25 = sphi %s1090_s25, %s1357_s25  }
   0x7   : > { %s1115_s14 = sadd.s32 1, %s1009_s28   ;;  %s311_s15 = sadd.s32 1, %s1005_s27 }
   0x8   : > { %s308_s16 = ssub.s32 %s1009_s28, %s1115_s14  ;;  %p321_p0 = scmp.ne.s32.totalorder %s1005_s27, %s1001_s26 }
   0x9   : > { %p309_p1 = scmp.eq.s32.totalorder %s308_s16, 0  ;;  %p322_p2 = scmp.eq.s32.totalorder %s1111_s29, 1 }
   0xa   : > { %p327_p3 = scmp.ne.s32.totalorder %s1001_s26, %s997_s25  ;;  %p328_p4 = scmp.eq.s32.totalorder %s865_s30, 1 }
   0xb   : > { %s1126_s17 = scalar_select %p309_p1, %s1005_s27, %s311_s15  }
   0xc   : > { %p1128_p5 = por %p322_p2, %p321_p0  ;;  %p1132_p6 = por %p328_p4, %p327_p3 }
   0xd   : > { %1343 = sst [smem:[#allocation5_spill]] %s1126_s17  ;;  %p868_p7 = scmp.ge.s32.totalorder %s1009_s28, 1 }
   0xe   : > { %p389_p8 = scmp.lt.s32.totalorder %s1009_s28, 3 }
  0x10   : > { %p390_p9 = pnand %p868_p7, %p389_p8 }
  0x11   : > { %p432_p10 = scmp.lt.s32.totalorder (!%p390_p9), %s1111_s29, 1  ;;  %s1346_s0 = sld [smem:[#allocation6_spill]] (!%p390_p9) }
  0x12   : > { %393 = sbr.rel (%p390_p9) target bundleno = 605 (0x25d), region = 72  ;;  %s1334_s16 = smov (!%p390_p9), 7  }
  0x13   : > { %s1333_s20 = smov (!%p390_p9), 9   ;;  %s1335_s21 = smov (!%p390_p9), 1  }
  0x14   : > { %s1337_s24 = smov (!%p390_p9), 127   ;;  %s1338_s17 = smov (!%p390_p9), 121  }
  0x15   : > { %s1339_s30 = smov (!%p390_p9), 120   ;;  %s1347_s1 = sld [smem:[#allocation7_spill]] (!%p390_p9) }
  0x17   : > { %v871_v0 = vld [vmem:[%s1322_s3 + $0x4] sm:$0xf]  ;;  %v1011_v1 = vmov 0   ;;  %s433_s22 = scalar_select %p432_p10, %s1111_s29, 1  ;;  %v449_v3 = vld [vmem:[%s1322_s3] sm:$0xf] }
  0x18   : > { %943 = vset.pattern.permute.xlu2 %v1011_v1  ;;  %942 = vset.pattern.permute.xlu1 %v1011_v1  ;;  %v873_v4 = vld [vmem:[%s1322_s3 + $0xc] sm:$0xf]  ;;  %v872_v5 = vld [vmem:[%s1322_s3 + $0x8] sm:$0xf]  ;;  %v874_v6 = vld [vmem:[%s1322_s3 + $0x10] sm:$0xf] }
  0x19   : > { %466 = vperm.xlu2 %943, %v871_v0   ;;  %944 = vset.pattern.permute.xlu0 %v1011_v1  ;;  %s870_s23 = sshll.u32 %s433_s22, 2  ;;  %v875_v7 = vld [vmem:[%s1322_s3 + $0x14] sm:$0xf]  ;;  %v876_v8 = vld [vmem:[%s1322_s3 + $0x18] sm:$0xf]  ;;  %v615_v12 = vld [vmem:[%s1326_s7] sm:$0xff] }
  0x1a   : > { %s435_s15 = scalar_lea.vmem %s1346_s0, %s870_s23  ;;  %s1336_s23 = smov 8   ;;  %v878_v9 = vld [vmem:[%s1322_s3 + $0x20] sm:$0xf]  ;;  %v877_v10 = vld [vmem:[%s1322_s3 + $0x1c] sm:$0xf]  ;;  %v885_v15 = vld [vmem:[%s1327_s8 + $0x28] sm:$0xff] }
  0x1b   : > { %v1146_v2 = vld [vmem:[%s435_s15] sm:$0xf]  ;;  %s1340_s15 = smov 119   ;;  %v881_v16 = vld [vmem:[%s1327_s8 + $0x8] sm:$0xff]  ;;  %v882_v17 = vld [vmem:[%s1327_s8 + $0x10] sm:$0xff]  ;;  %vm443_vm0 = vcmask 72704  }
  0x1c   : > { %471 = vrot.lane.b32.xlu1 %v1146_v2, %s1334_s16  ;;  %440 = vrot.lane.b32.xlu0 %v1146_v2, %s1333_s20  ;;  %v572_v11 = vld [vmem:[%s1323_s4] sm:$0xf]  ;;  %v883_v18 = vld [vmem:[%s1327_s8 + $0x18] sm:$0xff]  ;;  %vm474_vm1 = vcmask 56320   ;;  %vm460_vm2 = vcmask 64512   ;;  %vm492_vm3 = vcmask 7168  }
  0x1d   : > { %v608_v13 = vld [vmem:[%s1325_s6] sm:$0xff]  ;;  %vm516_vm4 = vcmask 515072   ;;  %vm531_vm5 = vcmask 465920   ;;  %vm560_vm6 = vcmask 449536   ;;  %vm546_vm7 = vcmask 457728   ;;  %s1348_s0 = smov 7  }
  0x1e   : > { %v629_v14 = vld [vmem:[%s1327_s8] sm:$0xff]  ;;  %vm584_vm8 = vcmask 1043456   ;;  %vm580_vm9 = vcmask 31744   ;;  %s1353_s20 = smov 127   ;;  %vm788_vm10 = vcmask 523264  }
  0x1f   : > { %v884_v19 = vld [vmem:[%s1327_s8 + $0x20] sm:$0xff] }
  0x20   : > { %v1218_v27 = vld [vmem:[%s1347_s1] ss:$0 sm:$0xff] }
  0x21   : > { %489 = vrot.lane.b32.xlu2 %v1146_v2, %s1335_s21  ;;  %v1224_v31 = vld [vmem:[%s1321_s2] ss:$0 sm:$0xff]  ;;  %s1350_s21 = smov 9  }
  0x24   : > { %452 = vperm.xlu1 %942, %v449_v3   ;;  %457 = vrot.lane.b32.xlu0 %v1146_v2, %s1336_s23  ;;  %s891_s23 = sshll.u32 %s1111_s29, 3 }
  0x29   : > { %513 = vrot.lane.b32.xlu2 %v1146_v2, %s1337_s24  ;;  %s801_s24 = scalar_lea.hbm %s1332_s13, %s891_s23 }
  0x2a   : > { %s805_s1 = sshll.u32 %s801_s24, 4  ;;  %s806_s1 = int_to_ptr.hbm [resolvable:$true] %s805_s1 }
  0x2b   : > { %s961_s29 = sshra.s32 %s806_s1, 4  ;;  %s962_s29 = int_to_ptr.hbm [resolvable:$true] %s961_s29 }
  0x2c   : > { %499 = vperm.xlu1 %942, %v873_v4   ;;  %484 = vperm.xlu0 %944, %v872_v5   ;;  %p968_p0 = scmp.lt.s32.totalorder %s962_s29, %s1332_s13 }
  0x31   : > { %528 = vrot.lane.b32.xlu2 %v1146_v2, %s1338_s17  ;;  %s1351_s17 = smov 1  }
  0x34   : > { %508 = vperm.xlu1 %942, %v874_v6   ;;  %523 = vperm.xlu0 %944, %v875_v7  }
  0x39   : > { %543 = vrot.lane.b32.xlu2 %v1146_v2, %s1339_s30  ;;  %s1352_s30 = smov 121  }
  0x3c   : > { %538 = vperm.xlu1 %942, %v876_v8   ;;  %557 = vrot.lane.b32.xlu0 %v1146_v2, %s1340_s15  ;;  %v579_v8 = vld [vmem:[%s1324_s5] sm:$0xff]  ;;  %s1349_s15 = smov 8  }
  0x41   : > { %567 = vperm.xlu2 %943, %v878_v9  }
  0x44   : > { %552 = vperm.xlu1 %942, %v877_v10   ;;  %575 = vperm.xlu0 %944, %v572_v11  }
  0x49   : > { %618 = vperm.xlu2 %943, %v615_v12  }
  0x4c   : > { %611 = vperm.xlu1 %942, %v608_v13   ;;  %632 = vperm.xlu0 %944, %v629_v14  }
  0x51   : > { %696 = vperm.xlu2 %943, %v885_v15   ;;  %v886_v15 = vld [vmem:[%s1327_s8 + $0x30] sm:$0xff] }
  0x54   : > { %645 = vperm.xlu1 %942, %v881_v16   ;;  %659 = vperm.xlu0 %944, %v882_v17   ;;  %v887_v16 = vld [vmem:[%s1327_s8 + $0x38] sm:$0xff]  ;;  %v888_v17 = vld [vmem:[%s1327_s8 + $0x40] sm:$0xff] }
  0x5c   : > { %673 = vperm.xlu1 %942, %v883_v18   ;;  %682 = vperm.xlu0 %944, %v884_v19   ;;  %v773_v18 = vld [vmem:[%s1330_s11] sm:$0xff] }
  0x5d   : > { %v742_v19 = vld [vmem:[%s1328_s9] sm:$0xff] }
  0x73   : > { %v467_v20 = vpop.permute.xlu2 %466 }
  0x7b   : > { %v490_v23 = vpop.permute.xlu2 %489 }
  0x7c   : > { %v493_v42 = vsel %vm492_vm3, 0.0, %v490_v23 }
  0x7d   : > { %v494_v44 = vmul.f32 %v1218_v27, %v493_v42 }
  0x83   : > { %v514_v26 = vpop.permute.xlu2 %513 }
  0x84   : > { %v517_v48 = vsel %vm516_vm4, %v514_v26, 0.0 }
  0x85   : > { %v518_v54 = vmul.f32 %v1224_v31, %v517_v48 }
  0x8b   : > { %v529_v35 = vpop.permute.xlu2 %528 }
  0x8c   : > { %v532_v49 = vsel %vm531_vm5, %v529_v35, 0.0 }
  0x8d   : > { %v533_v55 = vmul.f32 %v1218_v27, %v532_v49 }
  0x8e   : > { %v472_v21 = vpop.permute.xlu1 %471  ;;  %v441_v22 = vpop.permute.xlu0 %440 }
  0x8f   : > { %v444_v28 = vsel %vm443_vm0, 0.0, %v441_v22  ;;  %v475_v33 = vsel %vm474_vm1, 0.0, %v472_v21 }
  0x90   : > { %v448_v32 = vmul.f32 %v1218_v27, %v444_v28  ;;  %v479_v36 = vmul.f32 %v1224_v31, %v475_v33 }
  0x93   : > { %v544_v50 = vpop.permute.xlu2 %543 }
  0x94   : > { %v547_v62 = vsel %vm546_vm7, %v544_v50, 0.0 }
  0x96   : > { %v453_v24 = vpop.permute.xlu1 %452  ;;  %v458_v25 = vpop.permute.xlu0 %457 }
  0x97   : > { %v461_v34 = vsel %vm460_vm2, 0.0, %v458_v25  ;;  %v455_v37 = vmul.f32 %v453_v24, %v448_v32 }
  0x98   : > { %v469_v38 = vmul.f32 %v467_v20, %v461_v34  ;;  %v780_v20 = vld [vmem:[%s1331_s12] sm:$0xff] }
  0x9a   : > { %v470_v43 = vadd.f32 %v469_v38, %v455_v37 }
  0x9e   : > { %v500_v29 = vpop.permute.xlu1 %499  ;;  %v485_v30 = vpop.permute.xlu0 %484 }
  0x9f   : > { %v487_v41 = vmul.f32 %v485_v30, %v479_v36  ;;  %v502_v46 = vmul.f32 %v500_v29, %v494_v44 }
  0xa1   : > { %v488_v45 = vadd.f32 %v487_v41, %v470_v43 }
  0xa3   : > { %v503_v52 = vadd.f32 %v502_v46, %v488_v45 }
  0xa6   : > { %v509_v39 = vpop.permute.xlu1 %508  ;;  %v524_v40 = vpop.permute.xlu0 %523 }
  0xa7   : > { %v511_v47 = vmul.f32 %v509_v39, %v1146_v2  ;;  %v526_v58 = vmul.f32 %v524_v40, %v518_v54  ;;  %v568_v2 = vpop.permute.xlu2 %567 }
  0xa9   : > { %v512_v56 = vadd.f32 %v511_v47, %v503_v52 }
  0xab   : > { %v527_v60 = vadd.f32 %v526_v58, %v512_v56 }
  0xae   : > { %v539_v51 = vpop.permute.xlu1 %538  ;;  %v558_v53 = vpop.permute.xlu0 %557 }
  0xaf   : > { %v561_v57 = vsel %vm560_vm6, %v558_v53, 0.0  ;;  %v541_v59 = vmul.f32 %v539_v51, %v533_v55  ;;  %v619_v12 = vpop.permute.xlu2 %618 }
  0xb0   : > { %v562_v61 = vmul.f32 %v1224_v31, %v561_v57 }
  0xb1   : > { %v542_v0 = vadd.f32 %v541_v59, %v527_v60 }
  0xb2   : > { %v570_v3 = vmul.f32 %v568_v2, %v562_v61 }
  0xb6   : > { %v553_v63 = vpop.permute.xlu1 %552  ;;  %v576_v6 = vpop.permute.xlu0 %575 }
  0xb7   : > { %v555_v1 = vmul.f32 %v553_v63, %v547_v62  ;;  %v697_v22 = vpop.permute.xlu2 %696 }
  0xb9   : > { %v556_v4 = vadd.f32 %v555_v1, %v542_v0 }
  0xbb   : > { %v571_v5 = vadd.f32 %v570_v3, %v556_v4 }
  0xbd   : > { %v578_v7 = vadd.f32 %v576_v6, %v571_v5 }
  0xbe   : > { %v612_v9 = vpop.permute.xlu1 %611  ;;  %v633_v21 = vpop.permute.xlu0 %632 }
  0xbf   : > { %879 = vmatpush.msk.msra.mxu0 %vm584_vm8, %v578_v7 }
  0xc0   : > { %880 = vmatmul.msk.f32.vlgmr.msra.gmra.mxu0 %vm580_vm9, %v579_v8 }
  0xc6   : > { %v646_v23 = vpop.permute.xlu1 %645  ;;  %v660_v24 = vpop.permute.xlu0 %659 }
  0xce   : > { %v674_v26 = vpop.permute.xlu1 %673  ;;  %v683_v28 = vpop.permute.xlu0 %682 }
 0x13d   : > { %v605_v10 = vpop.f32.mrf.mxu0 }
 0x13e   : > { %v614_v11 = vmul.f32 %v612_v9, %v605_v10 }
 0x140   : > { %v621_v13 = vadd.f32 %v619_v12, %v614_v11 }
 0x142   : > { %v622_v14 = vmax.f32 %v621_v13, 0.0 }
 0x144   : > { %650 = vrot.lane.b32.xlu2 %v622_v14, %s1348_s0  ;;  %637 = vrot.lane.b32.xlu1 %v622_v14, %s1349_s15  ;;  %s1354_s0 = smov 120   ;;  %v685_v52 = vmul.f32 %v683_v28, %v622_v14  ;;  %s963_s15 = scalar_lea.hbm %s962_s29, 8 }
 0x145   : > { %624 = vrot.lane.b32.xlu0 %v622_v14, %s1350_s21  ;;  %s429_s21 = sand.u32 1, %s1001_s26   ;;  %p964_p11 = scmp.ne.s32.totalorder %s962_s29, %s963_s15 }
 0x146   : > { %s869_s22 = sshll.u32 %s429_s21, 3 }
 0x147   : > { %s431_s16 = scalar_lea.vmem [#allocation2], %s869_s22  ;;  %p965_p12 = pnand %p964_p11, %p1128_p5 }
 0x148   : > { %s967_s22 = scalar_lea.hbm %s1332_s13, 16 }
 0x149   : > { %p966_p13 = pneg %p965_p12  ;;  %p969_p1 = scmp.lt.s32.totalorder %s967_s22, %s963_s15 }
 0x14b   : > { %p970_p2 = por %p969_p1, %p968_p0 }
 0x14c   : > { %664 = vrot.lane.b32.xlu2 %v622_v14, %s1351_s17  ;;  %701 = vrot.lane.b32.xlu1 %v622_v14, %s1352_s30  ;;  %s1355_s17 = smov 119  }
 0x14d   : > { %710 = vperm.xlu0 %944, %v886_v15   ;;  %p971_p3 = pnand %p970_p2, %p966_p13 }
 0x154   : > { %687 = vrot.lane.b32.xlu2 %v622_v14, %s1353_s20  ;;  %715 = vrot.lane.b32.xlu1 %v622_v14, %s1354_s0  ;;  %s803_s20 = sshll.u32 %s431_s16, 4  ;;  %s791_s0 = scalar_lea.sflag [#allocation3], %s429_s21  ;;  %s804_s20 = int_to_ptr.vmem [resolvable:$true] %s803_s20 }
 0x155   : > { %723 = vperm.xlu0 %944, %v887_v16  }
 0x15c   : > { %728 = vrot.lane.b32.xlu2 %v622_v14, %s1355_s17  ;;  %737 = vperm.xlu1 %942, %v888_v17  }
 0x15d   : > { %776 = vperm.xlu0 %944, %v773_v18  }
 0x164   : > { %745 = vperm.xlu2 %943, %v742_v19   ;;  %783 = vperm.xlu1 %942, %v780_v20  }
 0x19e   : > { %v651_v25 = vpop.permute.xlu2 %650 }
 0x19f   : > { %v653_v30 = vsel %vm474_vm1, 0.0, %v651_v25 }
 0x1a0   : > { %v654_v37 = vmul.f32 %v1224_v31, %v653_v30 }
 0x1a2   : > { %v662_v42 = vmul.f32 %v660_v24, %v654_v37 }
 0x1a6   : > { %v665_v29 = vpop.permute.xlu2 %664 }
 0x1a7   : > { %v667_v34 = vsel %vm492_vm3, 0.0, %v665_v29 }
 0x1a8   : > { %v668_v39 = vmul.f32 %v1218_v27, %v667_v34 }
 0x1aa   : > { %v676_v46 = vmul.f32 %v674_v26, %v668_v39 }
 0x1ae   : > { %v688_v43 = vpop.permute.xlu2 %687 }
 0x1af   : > { %v690_v49 = vsel %vm516_vm4, %v688_v43, 0.0 }
 0x1b0   : > { %v691_v51 = vmul.f32 %v1224_v31, %v690_v49 }
 0x1b2   : > { %v699_v56 = vmul.f32 %v697_v22, %v691_v51 }
 0x1b6   : > { %v638_v32 = vpop.permute.xlu1 %637  ;;  %v729_v57 = vpop.permute.xlu2 %728 }
 0x1b7   : > { %v625_v33 = vpop.permute.xlu0 %624  ;;  %v640_v35 = vsel %vm460_vm2, 0.0, %v638_v32  ;;  %v731_v62 = vsel %vm560_vm6, %v729_v57, 0.0 }
 0x1b8   : > { %v627_v36 = vsel %vm443_vm0, 0.0, %v625_v33  ;;  %v648_v40 = vmul.f32 %v646_v23, %v640_v35  ;;  %v732_v1 = vmul.f32 %v1224_v31, %v731_v62 }
 0x1b9   : > { %v628_v38 = vmul.f32 %v1218_v27, %v627_v36 }
 0x1bb   : > { %v635_v41 = vmul.f32 %v633_v21, %v628_v38 }
 0x1bd   : > { %v649_v44 = vadd.f32 %v648_v40, %v635_v41 }
 0x1be   : > { %v702_v45 = vpop.permute.xlu1 %701  ;;  %v746_v7 = vpop.permute.xlu2 %745 }
 0x1bf   : > { %v663_v47 = vadd.f32 %v662_v42, %v649_v44  ;;  %v711_v48 = vpop.permute.xlu0 %710  ;;  %v704_v53 = vsel %vm531_vm5, %v702_v45, 0.0 }
 0x1c0   : > { %v705_v58 = vmul.f32 %v1218_v27, %v704_v53  ;;  %v749_v27 = vld [vmem:[%s1329_s10] sm:$0xff] }
 0x1c1   : > { %v677_v50 = vadd.f32 %v676_v46, %v663_v47 }
 0x1c2   : > { %v713_v63 = vmul.f32 %v711_v48, %v705_v58 }
 0x1c3   : > { %v686_v54 = vadd.f32 %v685_v52, %v677_v50 }
 0x1c5   : > { %v700_v61 = vadd.f32 %v699_v56, %v686_v54 }
 0x1c6   : > { %v716_v55 = vpop.permute.xlu1 %715 }
 0x1c7   : > { %v718_v59 = vsel %vm546_vm7, %v716_v55, 0.0  ;;  %v724_v60 = vpop.permute.xlu0 %723  ;;  %v714_v2 = vadd.f32 %v713_v63, %v700_v61 }
 0x1c8   : > { %v726_v0 = vmul.f32 %v724_v60, %v718_v59 }
 0x1ca   : > { %v727_v4 = vadd.f32 %v726_v0, %v714_v2 }
 0x1ce   : > { %v738_v3 = vpop.permute.xlu1 %737 }
 0x1cf   : > { %v740_v5 = vmul.f32 %v738_v3, %v732_v1  ;;  %v777_v31 = vpop.permute.xlu0 %776 }
 0x1d1   : > { %v741_v6 = vadd.f32 %v740_v5, %v727_v4 }
 0x1d3   : > { %v748_v8 = vadd.f32 %v746_v7, %v741_v6 }
 0x1d5   : > { %768 = vmatpush.msra.mxu1 %v748_v8 }
 0x1d6   : > { %889 = vmatmul.msk.f32.vlgmr.msra.gmra.mxu1 %vm460_vm2, %v749_v27  ;;  %v784_v11 = vpop.permute.xlu1 %783 }
 0x253   : > { %v770_v9 = vpop.f32.mrf.mxu1 }
 0x254   : > { %v779_v10 = vmul.f32 %v777_v31, %v770_v9 }
 0x256   : > { %v786_v12 = vadd.f32 %v784_v11, %v779_v10 }
 0x258   : > { %v787_v13 = vmax.f32 %v786_v12, 0.0 }
 0x25a   : > { %789 = vst.msk [vmem:[%s431_s16] sm:$0xff] %vm788_vm10, %v787_v13 }
 0x25b   : > { %974 = shalt.err (!%p971_p3)
}
 0x25c   : > { %894 = dma.vmem_to_hbm [thread:$0]  (%p1128_p5), %s804_s20, 128, %s806_s1, %s791_s0  }
 0x25d PF: > { %p900_p4 = scmp.ge.s32.totalorder %s1009_s28, 2  ;;  %s817_s21 = sand.u32 1, %s997_s25  }
 0x25e   : > { %s818_s16 = scalar_lea.sflag [#allocation3], %s817_s21 }
 0x25f   : > { %p897_p7 = pnand %p900_p4, %p1132_p6 }
 0x261   : > { %p898_p8 = pneg %p897_p7 }
 0x263   : > { %992 = dma.done.wait (%p898_p8), %s818_s16, 128  }
 0x264   : > { %994 = vsyncadd (%p898_p8), %s818_s16, 4294967168  ;;  %s1356_s29 = sld [smem:[#allocation5_spill]]  ;;  %p23_p9 = scmp.ge.s32.totalorder %s1115_s14, 4  }
 0x265   : > { %s1357_s25 = smov %s1001_s26  ;;  %s1358_s26 = smov %s1005_s27 }
 0x266   : > { %s1360_s28 = smov %s1115_s14  ;;  %25 = sbr.rel (!%p23_p9) target bundleno = 6 (0x6), region = 123 }
 0x26a   : > { %s1359_s27 = smov %s1356_s29 }
 0x26b   :  { %824 = vsyncpa [#allocation3], 1 }
 0x26c   :  { %826 = vsyncpa [#allocation3 + $0x1], 1 }

</bundles_post_ra>
